<compile_context>
chip_gen: v7x
topology: tpu7x:2x2x1
jax: 0.10.0
libtpu: 0.0.40
codegen_flags: <defaults>
</compile_context>

<pallas_src>
import functools

import jax
import jax.numpy as jnp
from jax import lax
from jax.experimental import pallas as pl
from jax.experimental.pallas import tpu as pltpu


def _project_in_out_attn_kernel(x_ref, ctx_ref, wi_ref, bi_ref, wq_ref, wkv_ref,
                                wo_ref, bo_ref, wp_ref, bp_ref,
                                o_ref, attn_ref, *,
                                heads, dim_head, scale,
                                kv_include_self, has_context):
    """Grid = (batch,). One invocation handles all heads of one batch element."""
    inner = heads * dim_head

    x = x_ref[0]                                                   # (n, dim_in)

    # project_in: Linear(dim_in -> dim_out).
    xp = jnp.dot(x, wi_ref[...], preferred_element_type=jnp.float32) + bi_ref[...]

    # Key/value source sequence (torch: context = default(context, x);
    # if kv_include_self: context = cat((x, context), dim=1)).
    if has_context:
        ctx = ctx_ref[0]                                           # (m_ctx, dim_out)
        kv_src = jnp.concatenate([xp, ctx], axis=0) if kv_include_self else ctx
    else:
        kv_src = jnp.concatenate([xp, xp], axis=0) if kv_include_self else xp

    # Fused projections: one wide matmul for Q, one for [K|V].
    q = jnp.dot(xp, wq_ref[...], preferred_element_type=jnp.float32) * scale  # (n, inner)
    kv = jnp.dot(kv_src, wkv_ref[...], preferred_element_type=jnp.float32)    # (m, 2*inner)
    k = kv[:, :inner]
    v = kv[:, inner:]

    # Short, static head loop (fully unrolled -> visible to the LLO scheduler).
    attn_parts = []
    out_parts = []
    for h in range(heads):
        sl = slice(h * dim_head, (h + 1) * dim_head)
        qh, kh, vh = q[:, sl], k[:, sl], v[:, sl]

        # q @ k^T without materializing the transpose (contract last dims).
        dots = lax.dot_general(qh, kh, (((1,), (1,)), ((), ())),
                               preferred_element_type=jnp.float32)            # (n, m)
        dots = dots - jnp.max(dots, axis=-1, keepdims=True)
        e = jnp.exp(dots)
        # Approximate reciprocal runs on the otherwise-idle EUP slot.
        attn = e * pl.reciprocal(jnp.sum(e, axis=-1, keepdims=True), approx=True)

        attn_parts.append(attn)
        out_parts.append(jnp.dot(attn, vh, preferred_element_type=jnp.float32))

    # One store of the full (heads, n, m) attention slab per batch element.
    attn_ref[0] = jnp.stack(attn_parts, axis=0).astype(attn_ref.dtype)

    # Merge heads in-register, then ONE output projection + project_out,
    # and a single store of the main output per batch element.
    out_heads = jnp.concatenate(out_parts, axis=-1)                 # (n, inner)
    y = jnp.dot(out_heads, wo_ref[...], preferred_element_type=jnp.float32) + bo_ref[...]
    y = jnp.dot(y, wp_ref[...], preferred_element_type=jnp.float32) + bp_ref[...]
    o_ref[0] = y.astype(o_ref.dtype)


def project_in_out_attention_forward(x, context, kv_include_self,
                                     wi, bi, wq, wkv, wo, bo, wp, bp,
                                     *, heads, dim_head):
    """JAX wrapper mirroring ProjectInOut(Attention).forward(x, context, kv_include_self).

    For dim_in == dim_out (nn.Identity projections) pass wi/wp = identity
    matrices and bi/bp = zeros (exact in f32).
    Returns (x_out, attn) just like the PyTorch module.
    """
    b, n, dim_in = x.shape
    dim_out = wi.shape[1]
    inner = heads * dim_head
    scale = dim_head ** -0.5

    has_context = context is not None
    if not has_context:
        # Static placeholder so the operand list / BlockSpecs stay fixed; the
        # kernel never reads it on this path (it uses the projected x instead).
        context = jnp.zeros((b, 1, dim_out), dtype=jnp.float32)
    m_ctx = context.shape[1]
    if has_context:
        m = m_ctx + (n if kv_include_self else 0)
    else:
        m = n * (2 if kv_include_self else 1)

    kernel = functools.partial(
        _project_in_out_attn_kernel,
        heads=heads, dim_head=dim_head, scale=scale,
        kv_include_self=kv_include_self, has_context=has_context)

    out, attn = pl.pallas_call(
        kernel,
        out_shape=(jax.ShapeDtypeStruct((b, n, dim_in), jnp.float32),
                   jax.ShapeDtypeStruct((b, heads, n, m), jnp.float32)),
        grid_spec=pltpu.PrefetchScalarGridSpec(
            num_scalar_prefetch=0,
            grid=(b,),
            in_specs=[
                pl.BlockSpec((1, n, dim_in), lambda i: (i, 0, 0)),        # x
                pl.BlockSpec((1, m_ctx, dim_out), lambda i: (i, 0, 0)),   # context
                # Full weights, constant block index -> resident in VMEM,
                # no re-DMA across grid steps.
                pl.BlockSpec((dim_in, dim_out), lambda i: (0, 0)),        # W_in
                pl.BlockSpec((1, dim_out), lambda i: (0, 0)),             # b_in
                pl.BlockSpec((dim_out, inner), lambda i: (0, 0)),         # Wq (all heads)
                pl.BlockSpec((dim_out, 2 * inner), lambda i: (0, 0)),     # W[k|v] fused
                pl.BlockSpec((inner, dim_out), lambda i: (0, 0)),         # Wo
                pl.BlockSpec((1, dim_out), lambda i: (0, 0)),             # bo
                pl.BlockSpec((dim_out, dim_in), lambda i: (0, 0)),        # W_out
                pl.BlockSpec((1, dim_in), lambda i: (0, 0)),              # b_out
            ],
            out_specs=[
                pl.BlockSpec((1, n, dim_in), lambda i: (i, 0, 0)),        # projected-out x
                pl.BlockSpec((1, heads, n, m), lambda i: (i, 0, 0, 0)),   # attention probs
            ],
        ),
        compiler_params=pltpu.CompilerParams(
            dimension_semantics=("parallel",)),
    )(x, context, wi, bi, wq, wkv, wo, bo, wp, bp)
    return out, attn


def _reference(x, context, kv_include_self, wi, bi, wq, wkv, wo, bo, wp, bp,
               *, heads, dim_head):
    """Pure-JAX reference mirroring the PyTorch ProjectInOut(Attention) forward."""
    xp = x @ wi + bi
    ctx = xp if context is None else context
    if kv_include_self:
        ctx = jnp.concatenate([xp, ctx], axis=1)
    b, n, _ = xp.shape
    q = xp @ wq
    k, v = jnp.split(ctx @ wkv, 2, axis=-1)

    def split_heads(t):
        return t.reshape(t.shape[0], t.shape[1], heads, dim_head).transpose(0, 2, 1, 3)

    qh, kh, vh = split_heads(q), split_heads(k), split_heads(v)
    dots = jnp.einsum('bhid,bhjd->bhij', qh, kh) * (dim_head ** -0.5)
    attn = jax.nn.softmax(dots, axis=-1)
    out = jnp.einsum('bhij,bhjd->bhid', attn, vh)
    out = out.transpose(0, 2, 1, 3).reshape(b, n, heads * dim_head)
    out = out @ wo + bo
    out = out @ wp + bp
    return out, attn


if __name__ == "__main__":
    # Small CrossViT-style shapes: small-branch tokens (dim_in) cross-attend to
    # large-branch tokens (dim_out) with kv_include_self=True.
    b, n, m_ctx = 2, 8, 8
    dim_in, dim_out = 32, 64           # dim_in != dim_out -> real Linear projections
    heads, dim_head = 4, 16
    inner = heads * dim_head           # 64

    key = jax.random.PRNGKey(0)
    kx, kc, k1, k2, k3, k4, k5, k6, k7, k8 = jax.random.split(key, 10)

    x = jax.random.normal(kx, (b, n, dim_in), dtype=jnp.float32)
    context = jax.random.normal(kc, (b, m_ctx, dim_out), dtype=jnp.float32)

    # Deterministic synthetic parameters (transposed-PyTorch layout).
    wi = jax.random.normal(k1, (dim_in, dim_out), dtype=jnp.float32) * 0.05
    bi = jax.random.normal(k2, (1, dim_out), dtype=jnp.float32) * 0.05
    wq = jax.random.normal(k3, (dim_out, inner), dtype=jnp.float32) * 0.05
    wkv = jax.random.normal(k4, (dim_out, 2 * inner), dtype=jnp.float32) * 0.05  # to_kv fused
    wo = jax.random.normal(k5, (inner, dim_out), dtype=jnp.float32) * 0.05
    bo = jax.random.normal(k6, (1, dim_out), dtype=jnp.float32) * 0.05
    wp = jax.random.normal(k7, (dim_out, dim_in), dtype=jnp.float32) * 0.05
    bp = jax.random.normal(k8, (1, dim_in), dtype=jnp.float32) * 0.05

    out, attn = project_in_out_attention_forward(
        x, context, True, wi, bi, wq, wkv, wo, bo, wp, bp,
        heads=heads, dim_head=dim_head)
    out = jax.block_until_ready(out)
    attn = jax.block_until_ready(attn)

    ref_out, ref_attn = _reference(
        x, context, True, wi, bi, wq, wkv, wo, bo, wp, bp,
        heads=heads, dim_head=dim_head)

    assert out.shape == (b, n, dim_in)
    assert attn.shape == (b, heads, n, n + m_ctx)
    # Tolerance slightly loosened: pl.reciprocal(approx=True) in the softmax
    # denominator is not bit-exact vs jax.nn.softmax.
    assert jnp.allclose(out, ref_out, atol=5e-3, rtol=5e-3), "output mismatch vs reference"
    assert jnp.allclose(attn, ref_attn, atol=5e-3, rtol=5e-3), "attn mismatch vs reference"

    print("KERNEL_OK")
</pallas_src>

<mosaic_0001>
module attributes {stable_mosaic.version = 11 : i64} {
  func.func @_project_in_out_attn_kernel(%arg0: i32, %arg1: memref<1x8x32xf32, #tpu.memory_space<vmem>>, %arg2: memref<1x8x64xf32, #tpu.memory_space<vmem>>, %arg3: memref<32x64xf32, #tpu.memory_space<vmem>>, %arg4: memref<1x64xf32, #tpu.memory_space<vmem>>, %arg5: memref<64x64xf32, #tpu.memory_space<vmem>>, %arg6: memref<64x128xf32, #tpu.memory_space<vmem>>, %arg7: memref<64x64xf32, #tpu.memory_space<vmem>>, %arg8: memref<1x64xf32, #tpu.memory_space<vmem>>, %arg9: memref<64x32xf32, #tpu.memory_space<vmem>>, %arg10: memref<1x32xf32, #tpu.memory_space<vmem>>, %arg11: memref<1x8x32xf32, #tpu.memory_space<vmem>>, %arg12: memref<1x4x8x16xf32, #tpu.memory_space<vmem>>) attributes {dimension_semantics = [#tpu.dimension_semantics<parallel>], iteration_bounds = array<i64: 2>, scalar_prefetch = 0 : i64, scratch_operands = 0 : i64, tpu.core_type = #tpu.core_type<tc>, window_params = [{transform_indices = @transform_0, window_bounds = array<i64: 1, 8, 32>}, {transform_indices = @transform_1, window_bounds = array<i64: 1, 8, 64>}, {pipeline_mode = #tpu.pipeline_mode<synchronous>, transform_indices = @transform_2, window_bounds = array<i64: 32, 64>}, {pipeline_mode = #tpu.pipeline_mode<synchronous>, transform_indices = @transform_3, window_bounds = array<i64: 1, 64>}, {pipeline_mode = #tpu.pipeline_mode<synchronous>, transform_indices = @transform_4, window_bounds = array<i64: 64, 64>}, {pipeline_mode = #tpu.pipeline_mode<synchronous>, transform_indices = @transform_5, window_bounds = array<i64: 64, 128>}, {pipeline_mode = #tpu.pipeline_mode<synchronous>, transform_indices = @transform_6, window_bounds = array<i64: 64, 64>}, {pipeline_mode = #tpu.pipeline_mode<synchronous>, transform_indices = @transform_7, window_bounds = array<i64: 1, 64>}, {pipeline_mode = #tpu.pipeline_mode<synchronous>, transform_indices = @transform_8, window_bounds = array<i64: 64, 32>}, {pipeline_mode = #tpu.pipeline_mode<synchronous>, transform_indices = @transform_9, window_bounds = array<i64: 1, 32>}, {transform_indices = @transform_10, window_bounds = array<i64: 1, 8, 32>}, {transform_indices = @transform_11, window_bounds = array<i64: 1, 4, 8, 16>}]} {
    %c0 = arith.constant 0 : index
    %c0_0 = arith.constant 0 : index
    %c0_1 = arith.constant 0 : index
    %0 = vector.load %arg1[%c0, %c0_0, %c0_1] : memref<1x8x32xf32, #tpu.memory_space<vmem>>, vector<1x8x32xf32>
    %1 = vector.shape_cast %0 : vector<1x8x32xf32> to vector<8x32xf32>
    %c0_2 = arith.constant 0 : index
    %c0_3 = arith.constant 0 : index
    %2 = vector.load %arg3[%c0_2, %c0_3] : memref<32x64xf32, #tpu.memory_space<vmem>>, vector<32x64xf32>
    %cst = arith.constant dense<0.000000e+00> : vector<8x64xf32>
    %3 = tpu.matmul %1, %2, %cst {dimension_numbers = #tpu.dot_dimension_numbers<[1], [0], [0], [1], [0, 0, 1, 1], [], []>} : vector<8x32xf32>, vector<32x64xf32>, vector<8x64xf32> -> vector<8x64xf32>
    %c0_4 = arith.constant 0 : index
    %c0_5 = arith.constant 0 : index
    %4 = vector.load %arg4[%c0_4, %c0_5] : memref<1x64xf32, #tpu.memory_space<vmem>>, vector<1x64xf32>
    %5 = vector.broadcast %4 : vector<1x64xf32> to vector<8x64xf32>
    %6 = arith.addf %3, %5 : vector<8x64xf32>
    %c0_6 = arith.constant 0 : index
    %c0_7 = arith.constant 0 : index
    %c0_8 = arith.constant 0 : index
    %7 = vector.load %arg2[%c0_6, %c0_7, %c0_8] : memref<1x8x64xf32, #tpu.memory_space<vmem>>, vector<1x8x64xf32>
    %8 = vector.shape_cast %7 : vector<1x8x64xf32> to vector<8x64xf32>
    %9 = tpu.concatenate %6, %8 in 0 : vector<8x64xf32>, vector<8x64xf32> -> vector<16x64xf32>
    %c0_9 = arith.constant 0 : index
    %c0_10 = arith.constant 0 : index
    %10 = vector.load %arg5[%c0_9, %c0_10] : memref<64x64xf32, #tpu.memory_space<vmem>>, vector<64x64xf32>
    %cst_11 = arith.constant dense<0.000000e+00> : vector<8x64xf32>
    %11 = tpu.matmul %6, %10, %cst_11 {dimension_numbers = #tpu.dot_dimension_numbers<[1], [0], [0], [1], [0, 0, 1, 1], [], []>} : vector<8x64xf32>, vector<64x64xf32>, vector<8x64xf32> -> vector<8x64xf32>
    %cst_12 = arith.constant 2.500000e-01 : f32
    %12 = vector.broadcast %cst_12 : f32 to vector<8x64xf32>
    %13 = arith.mulf %11, %12 : vector<8x64xf32>
    %c0_13 = arith.constant 0 : index
    %c0_14 = arith.constant 0 : index
    %14 = vector.load %arg6[%c0_13, %c0_14] : memref<64x128xf32, #tpu.memory_space<vmem>>, vector<64x128xf32>
    %cst_15 = arith.constant dense<0.000000e+00> : vector<16x128xf32>
    %15 = tpu.matmul %9, %14, %cst_15 {dimension_numbers = #tpu.dot_dimension_numbers<[1], [0], [0], [1], [0, 0, 1, 1], [], []>} : vector<16x64xf32>, vector<64x128xf32>, vector<16x128xf32> -> vector<16x128xf32>
    %16 = vector.extract_strided_slice %15 {offsets = [0, 0], sizes = [16, 64], strides = [1, 1]} : vector<16x128xf32> to vector<16x64xf32>
    %17 = vector.extract_strided_slice %15 {offsets = [0, 64], sizes = [16, 64], strides = [1, 1]} : vector<16x128xf32> to vector<16x64xf32>
    %18 = vector.extract_strided_slice %13 {offsets = [0, 0], sizes = [8, 16], strides = [1, 1]} : vector<8x64xf32> to vector<8x16xf32>
    %19 = vector.extract_strided_slice %16 {offsets = [0, 0], sizes = [16, 16], strides = [1, 1]} : vector<16x64xf32> to vector<16x16xf32>
    %20 = vector.extract_strided_slice %17 {offsets = [0, 0], sizes = [16, 16], strides = [1, 1]} : vector<16x64xf32> to vector<16x16xf32>
    %cst_16 = arith.constant dense<0.000000e+00> : vector<8x16xf32>
    %21 = tpu.matmul %18, %19, %cst_16 {dimension_numbers = #tpu.dot_dimension_numbers<[1], [1], [0], [0], [0, 0, 1, 0], [], []>} : vector<8x16xf32>, vector<16x16xf32>, vector<8x16xf32> -> vector<8x16xf32>
    %cst_17 = arith.constant dense<0xFF800000> : vector<8xf32>
    %22 = vector.multi_reduction <maximumf>, %21, %cst_17 [1] : vector<8x16xf32> to vector<8xf32>
    %23 = vector.shape_cast %22 : vector<8xf32> to vector<8x1xf32>
    %24 = vector.broadcast %23 : vector<8x1xf32> to vector<8x16xf32>
    %25 = arith.subf %21, %24 : vector<8x16xf32>
    %26 = math.exp %25 : vector<8x16xf32>
    %cst_18 = arith.constant dense<0.000000e+00> : vector<8xf32>
    %27 = vector.multi_reduction <add>, %26, %cst_18 [1] : vector<8x16xf32> to vector<8xf32>
    %28 = vector.shape_cast %27 : vector<8xf32> to vector<8x1xf32>
    %29 = tpu.reciprocal %28 {approx = true} : vector<8x1xf32> -> vector<8x1xf32>
    %30 = vector.broadcast %29 : vector<8x1xf32> to vector<8x16xf32>
    %31 = arith.mulf %26, %30 : vector<8x16xf32>
    %cst_19 = arith.constant dense<0.000000e+00> : vector<8x16xf32>
    %32 = tpu.matmul %31, %20, %cst_19 {dimension_numbers = #tpu.dot_dimension_numbers<[1], [0], [0], [1], [0, 0, 1, 1], [], []>} : vector<8x16xf32>, vector<16x16xf32>, vector<8x16xf32> -> vector<8x16xf32>
    %33 = vector.extract_strided_slice %13 {offsets = [0, 16], sizes = [8, 16], strides = [1, 1]} : vector<8x64xf32> to vector<8x16xf32>
    %34 = vector.extract_strided_slice %16 {offsets = [0, 16], sizes = [16, 16], strides = [1, 1]} : vector<16x64xf32> to vector<16x16xf32>
    %35 = vector.extract_strided_slice %17 {offsets = [0, 16], sizes = [16, 16], strides = [1, 1]} : vector<16x64xf32> to vector<16x16xf32>
    %cst_20 = arith.constant dense<0.000000e+00> : vector<8x16xf32>
    %36 = tpu.matmul %33, %34, %cst_20 {dimension_numbers = #tpu.dot_dimension_numbers<[1], [1], [0], [0], [0, 0, 1, 0], [], []>} : vector<8x16xf32>, vector<16x16xf32>, vector<8x16xf32> -> vector<8x16xf32>
    %cst_21 = arith.constant dense<0xFF800000> : vector<8xf32>
    %37 = vector.multi_reduction <maximumf>, %36, %cst_21 [1] : vector<8x16xf32> to vector<8xf32>
    %38 = vector.shape_cast %37 : vector<8xf32> to vector<8x1xf32>
    %39 = vector.broadcast %38 : vector<8x1xf32> to vector<8x16xf32>
    %40 = arith.subf %36, %39 : vector<8x16xf32>
    %41 = math.exp %40 : vector<8x16xf32>
    %cst_22 = arith.constant dense<0.000000e+00> : vector<8xf32>
    %42 = vector.multi_reduction <add>, %41, %cst_22 [1] : vector<8x16xf32> to vector<8xf32>
    %43 = vector.shape_cast %42 : vector<8xf32> to vector<8x1xf32>
    %44 = tpu.reciprocal %43 {approx = true} : vector<8x1xf32> -> vector<8x1xf32>
    %45 = vector.broadcast %44 : vector<8x1xf32> to vector<8x16xf32>
    %46 = arith.mulf %41, %45 : vector<8x16xf32>
    %cst_23 = arith.constant dense<0.000000e+00> : vector<8x16xf32>
    %47 = tpu.matmul %46, %35, %cst_23 {dimension_numbers = #tpu.dot_dimension_numbers<[1], [0], [0], [1], [0, 0, 1, 1], [], []>} : vector<8x16xf32>, vector<16x16xf32>, vector<8x16xf32> -> vector<8x16xf32>
    %48 = vector.extract_strided_slice %13 {offsets = [0, 32], sizes = [8, 16], strides = [1, 1]} : vector<8x64xf32> to vector<8x16xf32>
    %49 = vector.extract_strided_slice %16 {offsets = [0, 32], sizes = [16, 16], strides = [1, 1]} : vector<16x64xf32> to vector<16x16xf32>
    %50 = vector.extract_strided_slice %17 {offsets = [0, 32], sizes = [16, 16], strides = [1, 1]} : vector<16x64xf32> to vector<16x16xf32>
    %cst_24 = arith.constant dense<0.000000e+00> : vector<8x16xf32>
    %51 = tpu.matmul %48, %49, %cst_24 {dimension_numbers = #tpu.dot_dimension_numbers<[1], [1], [0], [0], [0, 0, 1, 0], [], []>} : vector<8x16xf32>, vector<16x16xf32>, vector<8x16xf32> -> vector<8x16xf32>
    %cst_25 = arith.constant dense<0xFF800000> : vector<8xf32>
    %52 = vector.multi_reduction <maximumf>, %51, %cst_25 [1] : vector<8x16xf32> to vector<8xf32>
    %53 = vector.shape_cast %52 : vector<8xf32> to vector<8x1xf32>
    %54 = vector.broadcast %53 : vector<8x1xf32> to vector<8x16xf32>
    %55 = arith.subf %51, %54 : vector<8x16xf32>
    %56 = math.exp %55 : vector<8x16xf32>
    %cst_26 = arith.constant dense<0.000000e+00> : vector<8xf32>
    %57 = vector.multi_reduction <add>, %56, %cst_26 [1] : vector<8x16xf32> to vector<8xf32>
    %58 = vector.shape_cast %57 : vector<8xf32> to vector<8x1xf32>
    %59 = tpu.reciprocal %58 {approx = true} : vector<8x1xf32> -> vector<8x1xf32>
    %60 = vector.broadcast %59 : vector<8x1xf32> to vector<8x16xf32>
    %61 = arith.mulf %56, %60 : vector<8x16xf32>
    %cst_27 = arith.constant dense<0.000000e+00> : vector<8x16xf32>
    %62 = tpu.matmul %61, %50, %cst_27 {dimension_numbers = #tpu.dot_dimension_numbers<[1], [0], [0], [1], [0, 0, 1, 1], [], []>} : vector<8x16xf32>, vector<16x16xf32>, vector<8x16xf32> -> vector<8x16xf32>
    %63 = vector.extract_strided_slice %13 {offsets = [0, 48], sizes = [8, 16], strides = [1, 1]} : vector<8x64xf32> to vector<8x16xf32>
    %64 = vector.extract_strided_slice %16 {offsets = [0, 48], sizes = [16, 16], strides = [1, 1]} : vector<16x64xf32> to vector<16x16xf32>
    %65 = vector.extract_strided_slice %17 {offsets = [0, 48], sizes = [16, 16], strides = [1, 1]} : vector<16x64xf32> to vector<16x16xf32>
    %cst_28 = arith.constant dense<0.000000e+00> : vector<8x16xf32>
    %66 = tpu.matmul %63, %64, %cst_28 {dimension_numbers = #tpu.dot_dimension_numbers<[1], [1], [0], [0], [0, 0, 1, 0], [], []>} : vector<8x16xf32>, vector<16x16xf32>, vector<8x16xf32> -> vector<8x16xf32>
    %cst_29 = arith.constant dense<0xFF800000> : vector<8xf32>
    %67 = vector.multi_reduction <maximumf>, %66, %cst_29 [1] : vector<8x16xf32> to vector<8xf32>
    %68 = vector.shape_cast %67 : vector<8xf32> to vector<8x1xf32>
    %69 = vector.broadcast %68 : vector<8x1xf32> to vector<8x16xf32>
    %70 = arith.subf %66, %69 : vector<8x16xf32>
    %71 = math.exp %70 : vector<8x16xf32>
    %cst_30 = arith.constant dense<0.000000e+00> : vector<8xf32>
    %72 = vector.multi_reduction <add>, %71, %cst_30 [1] : vector<8x16xf32> to vector<8xf32>
    %73 = vector.shape_cast %72 : vector<8xf32> to vector<8x1xf32>
    %74 = tpu.reciprocal %73 {approx = true} : vector<8x1xf32> -> vector<8x1xf32>
    %75 = vector.broadcast %74 : vector<8x1xf32> to vector<8x16xf32>
    %76 = arith.mulf %71, %75 : vector<8x16xf32>
    %cst_31 = arith.constant dense<0.000000e+00> : vector<8x16xf32>
    %77 = tpu.matmul %76, %65, %cst_31 {dimension_numbers = #tpu.dot_dimension_numbers<[1], [0], [0], [1], [0, 0, 1, 1], [], []>} : vector<8x16xf32>, vector<16x16xf32>, vector<8x16xf32> -> vector<8x16xf32>
    %78 = vector.shape_cast %31 : vector<8x16xf32> to vector<1x8x16xf32>
    %79 = vector.shape_cast %46 : vector<8x16xf32> to vector<1x8x16xf32>
    %80 = vector.shape_cast %61 : vector<8x16xf32> to vector<1x8x16xf32>
    %81 = vector.shape_cast %76 : vector<8x16xf32> to vector<1x8x16xf32>
    %82 = tpu.concatenate %78, %79, %80, %81 in 0 : vector<1x8x16xf32>, vector<1x8x16xf32>, vector<1x8x16xf32>, vector<1x8x16xf32> -> vector<4x8x16xf32>
    %c0_32 = arith.constant 0 : index
    %c0_33 = arith.constant 0 : index
    %c0_34 = arith.constant 0 : index
    %c0_35 = arith.constant 0 : index
    %83 = vector.load %arg12[%c0_32, %c0_33, %c0_34, %c0_35] : memref<1x4x8x16xf32, #tpu.memory_space<vmem>>, vector<1x4x8x16xf32>
    %84 = vector.shape_cast %83 : vector<1x4x8x16xf32> to vector<4x8x16xf32>
    %85 = vector.shape_cast %82 : vector<4x8x16xf32> to vector<1x4x8x16xf32>
    tpu.vector_store %arg12[%c0_32, %c0_33, %c0_34, %c0_35], %85 {strides = array<i32>} : memref<1x4x8x16xf32, #tpu.memory_space<vmem>>, vector<1x4x8x16xf32>,
    %86 = tpu.concatenate %32, %47, %62, %77 in 1 : vector<8x16xf32>, vector<8x16xf32>, vector<8x16xf32>, vector<8x16xf32> -> vector<8x64xf32>
    %c0_36 = arith.constant 0 : index
    %c0_37 = arith.constant 0 : index
    %87 = vector.load %arg7[%c0_36, %c0_37] : memref<64x64xf32, #tpu.memory_space<vmem>>, vector<64x64xf32>
    %cst_38 = arith.constant dense<0.000000e+00> : vector<8x64xf32>
    %88 = tpu.matmul %86, %87, %cst_38 {dimension_numbers = #tpu.dot_dimension_numbers<[1], [0], [0], [1], [0, 0, 1, 1], [], []>} : vector<8x64xf32>, vector<64x64xf32>, vector<8x64xf32> -> vector<8x64xf32>
    %c0_39 = arith.constant 0 : index
    %c0_40 = arith.constant 0 : index
    %89 = vector.load %arg8[%c0_39, %c0_40] : memref<1x64xf32, #tpu.memory_space<vmem>>, vector<1x64xf32>
    %90 = vector.broadcast %89 : vector<1x64xf32> to vector<8x64xf32>
    %91 = arith.addf %88, %90 : vector<8x64xf32>
    %c0_41 = arith.constant 0 : index
    %c0_42 = arith.constant 0 : index
    %92 = vector.load %arg9[%c0_41, %c0_42] : memref<64x32xf32, #tpu.memory_space<vmem>>, vector<64x32xf32>
    %cst_43 = arith.constant dense<0.000000e+00> : vector<8x32xf32>
    %93 = tpu.matmul %91, %92, %cst_43 {dimension_numbers = #tpu.dot_dimension_numbers<[1], [0], [0], [1], [0, 0, 1, 1], [], []>} : vector<8x64xf32>, vector<64x32xf32>, vector<8x32xf32> -> vector<8x32xf32>
    %c0_44 = arith.constant 0 : index
    %c0_45 = arith.constant 0 : index
    %94 = vector.load %arg10[%c0_44, %c0_45] : memref<1x32xf32, #tpu.memory_space<vmem>>, vector<1x32xf32>
    %95 = vector.broadcast %94 : vector<1x32xf32> to vector<8x32xf32>
    %96 = arith.addf %93, %95 : vector<8x32xf32>
    %c0_46 = arith.constant 0 : index
    %c0_47 = arith.constant 0 : index
    %c0_48 = arith.constant 0 : index
    %97 = vector.load %arg11[%c0_46, %c0_47, %c0_48] : memref<1x8x32xf32, #tpu.memory_space<vmem>>, vector<1x8x32xf32>
    %98 = vector.shape_cast %97 : vector<1x8x32xf32> to vector<8x32xf32>
    %99 = vector.shape_cast %96 : vector<8x32xf32> to vector<1x8x32xf32>
    tpu.vector_store %arg11[%c0_46, %c0_47, %c0_48], %99 {strides = array<i32>} : memref<1x8x32xf32, #tpu.memory_space<vmem>>, vector<1x8x32xf32>,
    return
  }
  func.func @transform_0(%arg0: i32) -> (i32, i32, i32) {
    %c0_i32 = arith.constant 0 : i32
    %c0_i32_0 = arith.constant 0 : i32
    %c0_i32_1 = arith.constant 0 : i32
    return %arg0, %c0_i32, %c0_i32_0 : i32, i32, i32
  }
  func.func @transform_1(%arg0: i32) -> (i32, i32, i32) {
    %c0_i32 = arith.constant 0 : i32
    %c0_i32_0 = arith.constant 0 : i32
    %c0_i32_1 = arith.constant 0 : i32
    return %arg0, %c0_i32, %c0_i32_0 : i32, i32, i32
  }
  func.func @transform_2(%arg0: i32) -> (i32, i32) {
    %c0_i32 = arith.constant 0 : i32
    %c0_i32_0 = arith.constant 0 : i32
    %c0_i32_1 = arith.constant 0 : i32
    return %c0_i32, %c0_i32_0 : i32, i32
  }
  func.func @transform_3(%arg0: i32) -> (i32, i32) {
    %c0_i32 = arith.constant 0 : i32
    %c0_i32_0 = arith.constant 0 : i32
    %c0_i32_1 = arith.constant 0 : i32
    return %c0_i32, %c0_i32_0 : i32, i32
  }
  func.func @transform_4(%arg0: i32) -> (i32, i32) {
    %c0_i32 = arith.constant 0 : i32
    %c0_i32_0 = arith.constant 0 : i32
    %c0_i32_1 = arith.constant 0 : i32
    return %c0_i32, %c0_i32_0 : i32, i32
  }
  func.func @transform_5(%arg0: i32) -> (i32, i32) {
    %c0_i32 = arith.constant 0 : i32
    %c0_i32_0 = arith.constant 0 : i32
    %c0_i32_1 = arith.constant 0 : i32
    return %c0_i32, %c0_i32_0 : i32, i32
  }
  func.func @transform_6(%arg0: i32) -> (i32, i32) {
    %c0_i32 = arith.constant 0 : i32
    %c0_i32_0 = arith.constant 0 : i32
    %c0_i32_1 = arith.constant 0 : i32
    return %c0_i32, %c0_i32_0 : i32, i32
  }
  func.func @transform_7(%arg0: i32) -> (i32, i32) {
    %c0_i32 = arith.constant 0 : i32
    %c0_i32_0 = arith.constant 0 : i32
    %c0_i32_1 = arith.constant 0 : i32
    return %c0_i32, %c0_i32_0 : i32, i32
  }
  func.func @transform_8(%arg0: i32) -> (i32, i32) {
    %c0_i32 = arith.constant 0 : i32
    %c0_i32_0 = arith.constant 0 : i32
    %c0_i32_1 = arith.constant 0 : i32
    return %c0_i32, %c0_i32_0 : i32, i32
  }
  func.func @transform_9(%arg0: i32) -> (i32, i32) {
    %c0_i32 = arith.constant 0 : i32
    %c0_i32_0 = arith.constant 0 : i32
    %c0_i32_1 = arith.constant 0 : i32
    return %c0_i32, %c0_i32_0 : i32, i32
  }
  func.func @transform_10(%arg0: i32) -> (i32, i32, i32) {
    %c0_i32 = arith.constant 0 : i32
    %c0_i32_0 = arith.constant 0 : i32
    %c0_i32_1 = arith.constant 0 : i32
    return %arg0, %c0_i32, %c0_i32_0 : i32, i32, i32
  }
  func.func @transform_11(%arg0: i32) -> (i32, i32, i32, i32) {
    %c0_i32 = arith.constant 0 : i32
    %c0_i32_0 = arith.constant 0 : i32
    %c0_i32_1 = arith.constant 0 : i32
    %c0_i32_2 = arith.constant 0 : i32
    return %arg0, %c0_i32, %c0_i32_0, %c0_i32_1 : i32, i32, i32, i32
  }
}

</mosaic_0001>

<bundles_post_ra>
// kernel: tpu_custom_call.1
= control target key start
LH: loop header
LB: loop body
LE: loop exit
PB: predicated region body
PF: predicated region fallthrough
CT: control target
= control target key end

     0   :  { %s3089_s0 = inlined_call_operand.hbm [shape: f32[2,8,32], index: 0, kind: input, shape index: {}]   ;;  %s3090_s1 = inlined_call_operand.hbm [shape: f32[2,8,64], index: 1, kind: input, shape index: {}]   ;;  %s3091_s2 = inlined_call_operand.vmem [shape: f32[32,64], index: 2, kind: input, shape index: {}]   ;;  %s3092_s3 = inlined_call_operand.vmem [shape: f32[1,64], index: 3, kind: input, shape index: {}]   ;;  %s3093_s4 = inlined_call_operand.vmem [shape: f32[64,64], index: 4, kind: input, shape index: {}]   ;;  %s3094_s5 = inlined_call_operand.hbm [shape: f32[64,128], index: 5, kind: input, shape index: {}]   ;;  %s3095_s6 = inlined_call_operand.hbm [shape: f32[64,64], index: 6, kind: input, shape index: {}]   ;;  %s3096_s7 = inlined_call_operand.vmem [shape: f32[1,64], index: 7, kind: input, shape index: {}]   ;;  %s3097_s8 = inlined_call_operand.vmem [shape: f32[64,32], index: 8, kind: input, shape index: {}]   ;;  %s3098_s9 = inlined_call_operand.vmem [shape: f32[1,32], index: 9, kind: input, shape index: {}]   ;;  %s3099_s10 = inlined_call_operand.hbm [shape: f32[2,8,32], index: 10, kind: output, shape index: {0}]   ;;  %s3100_s11 = inlined_call_operand.hbm [shape: f32[2,4,8,16], index: 11, kind: output, shape index: {1}]  }
   0x1   :  { %3111 = sst [smem:[#allocation24_spill]] %s3094_s5 }
   0x2   :  { %3112 = sst [smem:[#allocation25_spill]] %s3095_s6 }
   0x3   :  { %3113 = sst [smem:[#allocation26_spill]] %s3099_s10 }
   0x4   :  { %17 = vsyncpa [#allocation3], 0 }
   0x5   :  { %19 = vsyncpa [#allocation3 + $0x1], 0 }
   0x6   :  { %20 = vsyncpa [#allocation6], 0 }
   0x7   :  { %22 = vsyncpa [#allocation6 + $0x1], 0 }
   0x8   :  { %23 = vsyncpa [#allocation9], 0 }
   0x9   :  { %24 = vsyncpa [#allocation4], 0 }
   0xa   :  { %26 = vsyncpa [#allocation4 + $0x1], 0 }
   0xb   :  { %27 = vsyncpa [#allocation12], 0 }
   0xc   :  { %29 = vsyncpa [#allocation12 + $0x1], 0  ;;  %s2591_s17 = smov 0   ;;  %s2593_s18 = smov 0  }
   0xd   :  { %s2595_s19 = smov 0   ;;  %s2597_s20 = smov 0  }
   0xe LB: > { %3114 = sst [smem:[#allocation19_spill]] %s2497_s17  ;;  %s2612_s21 = sadd.s32 4294967295, %s2509_s20   ;;  %s2509_s20 = sphi %s2597_s20, %s3142_s20   ;;  %s2505_s19 = sphi %s2595_s19, %s3144_s19   ;;  %s2501_s18 = sphi %s2593_s18, %s3146_s18   ;;  %s2497_s17 = sphi %s2591_s17, %s3145_s17  }
   0xf   : > { %3115 = sst [smem:[#allocation20_spill]] %s2505_s19  ;;  %s1797_s22 = sadd.s32 4294967294, %s2509_s20  }
  0x10   : > { %p55_p0 = scmp.ne.s32.totalorder %s2501_s18, %s2497_s17  ;;  %p3101_p1 = scmp.eq.s32.totalorder %s2612_s21, 0 }
  0x11   : > { %p279_p3 = scmp.eq.s32.totalorder %s1797_s22, 1  ;;  %p1798_p5 = scmp.ge.s32.totalorder %s2509_s20, 1 }
  0x12   : > { %p2621_p4 = por %p3101_p1, %p55_p0  ;;  %p312_p7 = scmp.lt.s32.totalorder %s2509_s20, 3 }
  0x13   : > { %p2626_p6 = por %p279_p3, %p55_p0  ;;  %s2511_s26 = smov [#allocation7]  }
  0x14   : > { %s3116_s23 = scalar_select %p2621_p4, 1, 0 }
  0x15   : > { %s3117_s24 = scalar_select %p2626_p6, 1, 0 }
  0x16   : > { %p2631_p8 = pnand %p1798_p5, %p312_p7  ;;  %s333_s27 = sshll.u32 %s2511_s26, 4  ;;  %s2635_s27 = int_to_ptr.vmem [resolvable:$true] %s333_s27 }
  0x17   : > { %3118 = sst [smem:[#allocation21_spill]] %s3117_s24  ;;  %s2512_s29 = smov [#allocation8]  }
  0x18   : > { %s3119_s25 = scalar_select %p2631_p8, 1, 0 }
  0x19   : > { %p2157_p9 = pneg %p2631_p8  ;;  %s346_s30 = sshll.u32 %s2512_s29, 4  ;;  %s2646_s30 = int_to_ptr.vmem [resolvable:$true] %s346_s30 }
  0x1a   : > { %s3121_s5 = sld [smem:[#allocation24_spill]] }
  0x1b   : > { %p2642_p11 = pnand %p2157_p9, %p3101_p1 }
  0x1d   : > { %p2285_p13 = pneg %p2642_p11 }
  0x20   : > { %s2283_s14 = scalar_lea.hbm %s3121_s5, 1024 }
  0x21   : > { %p2284_p12 = scmp.ne.s32.totalorder %s3121_s5, %s2283_s14  ;;  %p2290_p5 = scmp.lt.u32.totalorder %s2283_s14, %s3121_s5 }
  0x23   : > { %p2286_p0 = pnand %p2285_p13, %p2284_p12 }
  0x25   : > { %p2287_p3 = pneg %p2286_p0 }
  0x27   : > { %p2292_p7 = pnand %p2290_p5, %p2287_p3 }
  0x29   : > { %2295 = shalt.err (!%p2292_p7)
}
  0x2a   : > { %s2296_s29 = scalar_lea.vmem %s2635_s27, 1024  ;;  %p2304_p2 = scmp.lt.s32.totalorder %s2635_s27, %s2635_s27 }
  0x2b   : > { %p2297_p9 = scmp.ne.s32.totalorder %s2635_s27, %s2296_s29  ;;  %p2305_p12 = scmp.lt.s32.totalorder %s2296_s29, %s2296_s29 }
  0x2d   : > { %p2299_p10 = pnand %p2297_p9, %p2285_p13  ;;  %p2306_p0 = por %p2305_p12, %p2304_p2 }
  0x2f   : > { %p2300_p1 = pneg %p2299_p10 }
  0x31   : > { %p2307_p6 = pnand %p2306_p0, %p2300_p1 }
  0x33   : > { %2310 = shalt.err (!%p2307_p6)
}
  0x34   : > { %s2513_s12 = smov 128   ;;  %s2514_s13 = smov 8  }
  0x35   : > { %2160 = dma.hbm_to_vmem [thread:$0]  (!%p2642_p11), %s3121_s5, 1024, %s2635_s27, [#allocation6], %s2513_s12, %s2513_s12, %s2514_s13  }
  0x36   : > { %s3122_s6 = sld [smem:[#allocation25_spill]] }
  0x3c   : > { %s2311_s26 = scalar_lea.hbm %s3122_s6, 1024 }
  0x3d   : > { %p2312_p2 = scmp.ne.s32.totalorder %s3122_s6, %s2311_s26  ;;  %p2318_p10 = scmp.lt.u32.totalorder %s2311_s26, %s3122_s6 }
  0x3f   : > { %p2314_p1 = pnand %p2312_p2, %p2285_p13 }
  0x41   : > { %p2315_p6 = pneg %p2314_p1 }
  0x43   : > { %p2320_p3 = pnand %p2318_p10, %p2315_p6 }
  0x45   : > { %2323 = shalt.err (!%p2320_p3)
}
  0x46   : > { %s2324_s27 = scalar_lea.vmem %s2646_s30, 1024  ;;  %p2332_p12 = scmp.lt.s32.totalorder %s2646_s30, %s2646_s30 }
  0x47   : > { %p2325_p5 = scmp.ne.s32.totalorder %s2646_s30, %s2324_s27  ;;  %p2333_p0 = scmp.lt.s32.totalorder %s2324_s27, %s2324_s27 }
  0x49   : > { %p2327_p7 = pnand %p2325_p5, %p2285_p13  ;;  %p2334_p2 = por %p2333_p0, %p2332_p12 }
  0x4b   : > { %p2328_p9 = pneg %p2327_p7 }
  0x4d   : > { %p2335_p1 = pnand %p2334_p2, %p2328_p9 }
  0x4f   : > { %2338 = shalt.err (!%p2335_p1)
}
  0x50   : > { %2163 = dma.hbm_to_vmem [thread:$0]  (!%p2642_p11), %s3122_s6, 1024, %s2646_s30, [#allocation9], %s2513_s12, %s2513_s12, %s2514_s13  }
  0x51   : > { %s2701_s24 = sadd.s32 1, %s2509_s20   ;;  %s42_s28 = sadd.s32 1, %s2505_s19 }
  0x52   : > { %3123 = sst [smem:[#allocation22_spill]] %s2701_s24  ;;  %s39_s14 = ssub.s32 %s2509_s20, %s2701_s24 }
  0x53   : > { %p49_p13 = scmp.ne.s32.totalorder %s2505_s19, %s2501_s18  ;;  %p40_p6 = scmp.eq.s32.totalorder %s39_s14, 0 }
  0x54   : > { %p50_p10 = scmp.eq.s32.totalorder %s2509_s20, 0  ;;  %p3124_p3 = scmp.eq.s32.totalorder %s2612_s21, 1 }
  0x55   : > { %p2180_p7 = scmp.lt.s32.totalorder %s2509_s20, 2  ;;  %s369_s22 = sand.u32 1, %s2505_s19  }
  0x56   : > { %p2711_p5 = por %p3124_p3, %p49_p13  ;;  %p51_p9 = por %p50_p10, %p49_p13 }
  0x57   : > { %s2717_s16 = scalar_select %p40_p6, %s2505_s19, %s42_s28  }
  0x58   : > { %s3125_s15 = scalar_select %p2711_p5, 1, 0 }
  0x59   : > { %3126 = sst [smem:[#allocation23_spill]] %s2717_s16  ;;  %s2720_s30 = sshll.u32 %s369_s22, 3 }
  0x5a   : > { %s1803_s12 = sshll.u32 %s2509_s20, 7  ;;  %s373_s27 = scalar_lea.vmem [#allocation2], %s2720_s30 }
  0x5b   : > { %s2726_s29 = scalar_lea.hbm %s3089_s0, %s1803_s12  ;;  %s380_s10 = sshll.u32 %s373_s27, 4  ;;  %s2729_s10 = int_to_ptr.vmem [resolvable:$true] %s380_s10 }
  0x5c   : > { %p2731_p11 = pnand %p2180_p7, %p51_p9  ;;  %s2738_s13 = scalar_lea.hbm %s3090_s1, %s1803_s12 }
  0x5d   : > { %s387_s26 = sand.u32 1, %s2509_s20   ;;  %s370_s5 = scalar_lea.sflag [#allocation3], %s369_s22 }
  0x5e   : > { %s2339_s6 = scalar_lea.hbm %s2726_s29, 128  ;;  %p2341_p0 = pneg %p2731_p11 }
  0x5f   : > { %p2340_p12 = scmp.ne.s32.totalorder %s2726_s29, %s2339_s6  ;;  %s2344_s19 = scalar_lea.hbm %s3089_s0, 256 }
  0x60   : > { %p2345_p13 = scmp.lt.u32.totalorder %s2726_s29, %s3089_s0  ;;  %p2346_p6 = scmp.lt.u32.totalorder %s2344_s19, %s2339_s6 }
  0x61   : > { %p2342_p2 = pnand %p2341_p0, %p2340_p12  ;;  %p2348_p3 = scmp.lt.u32.totalorder %s2339_s6, %s2726_s29 }
  0x62   : > { %p2347_p10 = por %p2346_p6, %p2345_p13 }
  0x63   : > { %p2343_p1 = pneg %p2342_p2 }
  0x64   : > { %p2349_p7 = por %p2348_p3, %p2347_p10 }
  0x66   : > { %p2350_p9 = pnand %p2349_p7, %p2343_p1 }
  0x68   : > { %2353 = shalt.err (!%p2350_p9)
}
  0x69   : > { %s2354_s22 = scalar_lea.vmem %s2729_s10, 128  ;;  %s2515_s16 = smov [#allocation2]  }
  0x6a   : > { %p2355_p12 = scmp.ne.s32.totalorder %s2729_s10, %s2354_s22  ;;  %s2359_s12 = sshll.u32 %s2515_s16, 4  ;;  %s2360_s12 = int_to_ptr.vmem [resolvable:$false] %s2359_s12 }
  0x6b   : > { %s2361_s24 = scalar_lea.vmem %s2360_s12, 256  ;;  %p2362_p4 = scmp.lt.s32.totalorder %s2729_s10, %s2360_s12 }
  0x6c   : > { %p2357_p2 = pnand %p2355_p12, %p2341_p0  ;;  %p2363_p13 = scmp.lt.s32.totalorder %s2361_s24, %s2354_s22 }
  0x6e   : > { %p2358_p5 = pneg %p2357_p2  ;;  %p2364_p6 = por %p2363_p13, %p2362_p4 }
  0x70   : > { %p2365_p10 = pnand %p2364_p6, %p2358_p5 }
  0x72   : > { %2368 = shalt.err (!%p2365_p10)
}
  0x73   : > { %2167 = dma.hbm_to_vmem [thread:$0]  (!%p2731_p11), %s2726_s29, 128, %s2729_s10, %s370_s5  }
  0x74   : > { %s391_s6 = scalar_lea.vmem [#allocation5], %s2720_s30  ;;  %s388_s14 = scalar_lea.sflag [#allocation6], %s387_s26 }
  0x75   : > { %s398_s19 = sshll.u32 %s391_s6, 4  ;;  %s2369_s27 = scalar_lea.hbm %s2738_s13, 128  ;;  %s399_s19 = int_to_ptr.vmem [resolvable:$true] %s398_s19 }
  0x76   : > { %p2370_p4 = scmp.ne.s32.totalorder %s2738_s13, %s2369_s27  ;;  %s2374_s16 = scalar_lea.hbm %s3090_s1, 256 }
  0x77   : > { %p2375_p3 = scmp.lt.u32.totalorder %s2738_s13, %s3090_s1  ;;  %p2376_p7 = scmp.lt.u32.totalorder %s2374_s16, %s2369_s27 }
  0x78   : > { %p2372_p5 = pnand %p2370_p4, %p2341_p0  ;;  %p2378_p12 = scmp.lt.u32.totalorder %s2369_s27, %s2738_s13 }
  0x79   : > { %p2377_p9 = por %p2376_p7, %p2375_p3 }
  0x7a   : > { %p2373_p1 = pneg %p2372_p5 }
  0x7b   : > { %p2379_p2 = por %p2378_p12, %p2377_p9 }
  0x7d   : > { %p2380_p13 = pnand %p2379_p2, %p2373_p1 }
  0x7f   : > { %2383 = shalt.err (!%p2380_p13)
}
  0x80   : > { %s2384_s5 = scalar_lea.vmem %s399_s19, 128  ;;  %s2516_s30 = smov [#allocation5]  }
  0x81   : > { %p2385_p6 = scmp.ne.s32.totalorder %s399_s19, %s2384_s5  ;;  %s2389_s29 = sshll.u32 %s2516_s30, 4  ;;  %s2390_s29 = int_to_ptr.vmem [resolvable:$false] %s2389_s29 }
  0x82   : > { %s2391_s10 = scalar_lea.vmem %s2390_s29, 256  ;;  %p2392_p5 = scmp.lt.s32.totalorder %s399_s19, %s2390_s29 }
  0x83   : > { %p2387_p10 = pnand %p2385_p6, %p2341_p0  ;;  %p2393_p8 = scmp.lt.s32.totalorder %s2391_s10, %s2384_s5 }
  0x85   : > { %p2388_p4 = pneg %p2387_p10  ;;  %p2394_p3 = por %p2393_p8, %p2392_p5 }
  0x87   : > { %p2395_p7 = pnand %p2394_p3, %p2388_p4 }
  0x89   : > { %2398 = shalt.err (!%p2395_p7)
}
  0x8a   : > { %2170 = dma.hbm_to_vmem [thread:$0]  (!%p2731_p11), %s2738_s13, 128, %s399_s19, %s388_s14  }
  0x8b   : > { %p3128_p1 = scmp.ne.s32.totalorder %s3119_s25, 0 }
  0x8c   : > { %s2791_s26 = sand.u32 (!%p3128_p1), 1, %s2501_s18   ;;  %p3129_p8 = scmp.ne.s32.totalorder (!%p3128_p1), %s3116_s23, 0 }
  0x8d   : > { %407 = sbr.rel (%p3128_p1) target bundleno = 3090 (0xc12), region = 60  ;;  %s2794_s6 = sshll.u32 (!%p3128_p1), %s2791_s26, 3 }
  0x8e   : > { %s410_s27 = scalar_lea.sflag (!%p3128_p1), [#allocation3], %s2791_s26  ;;  %s413_s28 = scalar_lea.vmem (!%p3128_p1), [#allocation2], %s2794_s6 }
  0x94   : > { %2472 = dma.done.wait (%p3129_p8), %s410_s27, 128  }
  0x95   : > { %2474 = vsyncadd (%p3129_p8), %s410_s27, 4294967168  ;;  %s418_s25 = sand.u32 1, %s2612_s21   ;;  %s422_s13 = scalar_lea.vmem [#allocation5], %s2794_s6 }
  0x96   : > { %s419_s17 = scalar_lea.sflag [#allocation6], %s418_s25 }
  0x97   : > { %2476 = dma.done.wait (%p3129_p8), %s419_s17, 128  }
  0x98   : > { %2478 = vsyncadd (%p3129_p8), %s419_s17, 4294967168  ;;  %p3130_p11 = scmp.eq.s32.totalorder %s2612_s21, 0 }
  0x9a   : > { %2480 = dma.done.wait (%p3130_p11), [#allocation6], 1024   ;;  %p3131_p0 = pmov %p3130_p11 }
  0x9c   : > { %2482 = vsyncadd (%p3131_p0), [#allocation6], 4294966272  ;;  %p3132_p9 = pmov %p3131_p0 }
  0x9d   : > { %p3133_p12 = pmov %p3131_p0 }
  0x9e   : > { %2484 = dma.done.wait (%p3132_p9), [#allocation9], 1024  }
  0x9f   : > { %2486 = vsyncadd (%p3133_p12), [#allocation9], 4294966272  ;;  %v2517_v0 = vmov 0.0|0.0   ;;  %vm2518_vm0 = vmmov 0   ;;  %v2519_v1 = vmov 0.0   ;;  %v480_v2 = vld [vmem:[%s3091_s2] sm:$0xff] }
  0xa0   : > { %2055 = vmatprep.subr.bf16.mxu0 %v2517_v0  ;;  %1920 = vmatprep.mubr.msk.f32.mxu0 %vm2518_vm0, %v2519_v1  ;;  %v481_v3 = vld [vmem:[%s3091_s2 + $0x8] sm:$0xff]  ;;  %v482_v4 = vld [vmem:[%s3091_s2 + $0x10] sm:$0xff]  ;;  %v483_v6 = vld [vmem:[%s3091_s2 + $0x18] sm:$0xff]  ;;  %vm491_vm1 = vcmask 261120   ;;  %vm574_vm2 = vcmask 523264   ;;  %vm735_vm3 = vcmask 130048  }
  0xa1   : > { %2061 = vmatprep.subr.bf16.mxu1 %v2517_v0  ;;  %1939 = vmatprep.mubr.msk.f32.mxu1 %vm2518_vm0, %v2519_v1  ;;  %v2056_v5 = vpack.c.bf16 %v481_v3, %v480_v2  ;;  %v566_v7 = vld [vmem:[%s3093_s4] sm:$0xff]  ;;  %v567_v8 = vld [vmem:[%s3093_s4 + $0x8] sm:$0xff]  ;;  %v2059_v11 = vpack.c.bf16 %v483_v6, %v482_v4  ;;  %v568_v13 = vld [vmem:[%s3093_s4 + $0x10] sm:$0xff]  ;;  %s2521_s27 = smov 64   ;;  %s2522_s25 = smov 48   ;;  %vm1439_vm5 = vcmask 392192  }
  0xa2   : > { %v649_v9 = vld [vmem:[#allocation7] sm:$0xff]  ;;  %v650_v10 = vld [vmem:[#allocation7 + $0x8] sm:$0xff]  ;;  %v2062_v12 = vpack.c.bf16 %v567_v8, %v566_v7  ;;  %v569_v14 = vld [vmem:[%s3093_s4 + $0x18] sm:$0xff]  ;;  %s2523_s17 = smov 96   ;;  %s1812_s23 = sshll.u32 %s2791_s26, 5 }
  0xa3   : > { %2057 = vmatpush3.bf16.msra.mxu0 %v2056_v5  ;;  %v2073_v15 = vpack.c.bf16 %v650_v10, %v649_v9  ;;  %v2065_v16 = vpack.c.bf16 %v569_v14, %v568_v13  ;;  %v651_v17 = vld [vmem:[#allocation7 + $0x10] sm:$0xff]  ;;  %v652_v18 = vld [vmem:[#allocation7 + $0x18] sm:$0xff]  ;;  %v570_v19 = vld [vmem:[%s3093_s4 + $0x20] sm:$0xff]  ;;  %s2915_s19 = scalar_lea.vmem [#allocation11], %s1812_s23  ;;  %s2524_s14 = smov 32  }
  0xa4   : > { %2058 = vmatprep.subr.bf16.mxu0 %v2517_v0  ;;  %2063 = vmatpush3.bf16.msra.mxu1 %v2062_v12  ;;  %v571_v20 = vld [vmem:[%s3093_s4 + $0x28] sm:$0xff]  ;;  %v2077_v22 = vpack.c.bf16 %v652_v18, %v651_v17  ;;  %v653_v24 = vld [vmem:[#allocation7 + $0x20] sm:$0xff]  ;;  %v572_v27 = vld [vmem:[%s3093_s4 + $0x30] sm:$0xff]  ;;  %s2525_s22 = smov 80   ;;  %s2526_s16 = smov 16  }
  0xa5   : > { %2064 = vmatprep.subr.bf16.mxu1 %v2517_v0  ;;  %v479_v21 = vld [vmem:[%s413_s28] sm:$0xff]  ;;  %v2068_v23 = vpack.c.bf16 %v571_v20, %v570_v19  ;;  %v573_v28 = vld [vmem:[%s3093_s4 + $0x38] sm:$0xff]  ;;  %v655_v29 = vld [vmem:[#allocation7 + $0x30] sm:$0xff]  ;;  %s1845_s5 = sshll.u32 %s2612_s21, 9  ;;  %s1650_s30 = sshll.u32 %s2915_s19, 4  ;;  %s3010_s30 = int_to_ptr.vmem [resolvable:$true] %s1650_s30 }
  0xa6   : > { %v654_v25 = vld [vmem:[#allocation7 + $0x28] sm:$0xff]  ;;  %v2071_v30 = vpack.c.bf16 %v573_v28, %v572_v27  ;;  %v656_v31 = vld [vmem:[#allocation7 + $0x38] sm:$0xff]  ;;  %v1813_v33 = vld [vmem:[%s3092_s3] ss:$0 sm:$0xff]  ;;  %p3136_p13 = scmp.ne.s32.totalorder %s3125_s15, 0  ;;  %s2527_s23 = smov [#allocation11]  }
  0xa7   : > { %2060 = vmatpush3.bf16.msra.mxu0 %v2059_v11  ;;  %v2081_v26 = vpack.c.bf16 %v654_v25, %v653_v24  ;;  %v2085_v32 = vpack.c.bf16 %v656_v31, %v655_v29  ;;  %v565_v37 = vld [vmem:[%s422_s13] sm:$0xff]  ;;  %vm2881_vm4 = vmpackc.low %vm735_vm3, %vm735_vm3  ;;  %s2520_s13 = smov 112  }
  0xa8   : > { %2074 = vmatprep.subr.bf16.mxu0 %v2073_v15  ;;  %2066 = vmatpush3.bf16.msra.mxu1 %v2065_v16 }
  0xa9   : > { %2067 = vmatprep.subr.bf16.mxu1 %v2517_v0 }
  0xaa   : > { %1921 = vmatmul.mubr.msk.f32.vlgmr.msra.gmra.mrb[0].mxu0 %vm491_vm1, %v479_v21 }
  0xab   : > { %2076 = vmatpush3.bf16.msra.mxu0 %v2073_v15 }
  0xac   : > { %2078 = vmatprep.subr.bf16.mxu0 %v2077_v22  ;;  %2069 = vmatpush3.bf16.msra.mxu1 %v2068_v23 }
  0xad   : > { %2070 = vmatprep.subr.bf16.mxu1 %v2517_v0 }
  0xaf   : > { %2080 = vmatpush3.bf16.msra.mxu0 %v2077_v22 }
  0xb0   : > { %2082 = vmatprep.subr.bf16.mxu0 %v2081_v26  ;;  %2072 = vmatpush3.bf16.msra.mxu1 %v2071_v30 }
  0xb1   : > { %2089 = vmatprep.subr.bf16.mxu1 %v2517_v0 }
  0xb3   : > { %2084 = vmatpush3.bf16.msra.mxu0 %v2081_v26 }
  0xb4   : > { %2086 = vmatprep.subr.bf16.mxu0 %v2085_v32 }
  0xb7   : > { %2088 = vmatpush3.bf16.msra.mxu0 %v2085_v32 }
  0xb8   : > { %2093 = vmatprep.subr.bf16.mxu0 %v2517_v0 }
 0x17d   : > { %v561_v34 = vpop.f32.mrb[0].mxu0 }
 0x17e   : > { %v562_v35 = vadd.f32 %v1813_v33, %v561_v34  ;;  %v1922_v36 = vpop.f32.mrb[1].mxu0 }
 0x180   : > { %1940 = vmatmul.mubr.msk.f32.vlgmr.msra.gmra.mrb[0].mxu1 %vm574_vm2, %v562_v35  ;;  %1958 = vmatprep.mubr.msk.f32.mxu0 %vm574_vm2, %v562_v35 }
 0x181   : > { %1959 = vmatmul.mubr.msk.f32.vlgmr.msra.gmra.mrb[2].mxu0 %vm574_vm2, %v565_v37  ;;  %1965 = vmatprep.mubr.msk.f32.mxu1 %vm2518_vm0, %v2519_v1 }
 0x182   : > { %1972 = vmatprep.mubr.msk.f32.mxu0 %vm2518_vm0, %v2519_v1 }
 0x253   : > { %v644_v38 = vpop.f32.mrb[0].mxu1 }
 0x254   : > { %v1941_v39 = vpop.f32.mrb[1].mxu1  ;;  %v1960_v40 = vpop.f32.mrb[2].mxu0  ;;  %v2891_v45 = vmul.f32 0.25, %v644_v38 }
 0x255   : > { %v726_v41 = vpop.f32.mrb[3].mxu0 }
 0x256   : > { %v2885_v43 = vpack.i.bf16 %v1960_v40, %v726_v41  ;;  %v2090_v44 = vpack.c.bf16 %v1960_v40, %v726_v41 }
 0x258   : > { %2233 = vrot.lane.b32.xlu0 %v2885_v43, %s2520_s13  ;;  %2092 = vmatpush3.bf16.xpose.msk.msra.mxu1 %vm2881_vm4, %v2090_v44 }
 0x259   : > { %2096 = vmatprep.subr.bf16.mxu1 %v2517_v0 }
 0x25c   : > { %905 = vrot.lane.b32.xlu0 %v2891_v45, %s2520_s13  ;;  %s3008_s13 = scalar_lea.hbm %s3100_s11, %s1845_s5 }
 0x25f   : > { %1966 = vmatmul.mubr.msk.f32.vlgmr.msra.gmra.mrb[2].mxu1 %vm735_vm3, %v2891_v45 }
 0x260   : > { %1979 = vmatprep.mubr.msk.f32.mxu1 %vm2518_vm0, %v2519_v1 }
 0x2ca   : > { %v2234_v46 = vpop.permute.xlu0 %2233 }
 0x2cb   : > { %v2236_v47 = vunpack.i.h.bf16 %v2234_v46  ;;  %v2235_v48 = vunpack.i.l.bf16 %v2234_v46 }
 0x2cd   : > { %v2097_v49 = vpack.c.bf16 %v2236_v47, %v2235_v48 }
 0x2ce   : > { %v906_v50 = vpop.permute.xlu0 %905 }
 0x2cf   : > { %2099 = vmatpush3.bf16.xpose.msk.msra.mxu1 %vm2881_vm4, %v2097_v49 }
 0x2d0   : > { %2107 = vmatprep.subr.bf16.mxu1 %v2517_v0 }
 0x2d6   : > { %1980 = vmatmul.mubr.msk.f32.vlgmr.msra.gmra.mrb[4].mxu1 %vm735_vm3, %v906_v50 }
 0x2d7   : > { %2000 = vmatprep.mubr.msk.f32.mxu1 %vm2518_vm0, %v2519_v1 }
 0x332   : > { %v811_v51 = vpop.f32.mrb[2].mxu1 }
 0x333   : > { %v1967_v52 = vpop.f32.mrb[3].mxu1  ;;  %v815_v53 = vsel %vm735_vm3, %v811_v51, -inf }
 0x334   : > { %816 = vmax.xlane.f32.xlu1 %v815_v53 }
 0x3a9   : > { %v983_v54 = vpop.f32.mrb[4].mxu1 }
 0x3aa   : > { %v1981_v55 = vpop.f32.mrb[5].mxu1  ;;  %v987_v56 = vsel %vm735_vm3, %v983_v54, -inf }
 0x3ab   : > { %988 = vmax.xlane.f32.xlu1 %v987_v56 }
 0x3bc   : > { %2238 = vrot.lane.b32.xlu1 %v2885_v43, %s2521_s27  ;;  %s1624_s27 = scalar_lea.sflag [#allocation12], %s2791_s26 }
 0x3c0   : > { %2243 = vrot.lane.b32.xlu1 %v2885_v43, %s2522_s25 }
 0x3c1   : > { %v817_v57 = vpop.xlane.xlu1 %816 }
 0x3c2   : > { %v818_v58 = vsub.f32 %v811_v51, %v817_v57 }
 0x3c4   : > { %v819_v59 = vmul.f32 1.442695, %v818_v58  ;;  %2248 = vrot.lane.b32.xlu1 %v2885_v43, %s2523_s17 }
 0x3c6   : > { %2267 = vpow2.f32 %v819_v59 }
 0x3d0   : > { %v2268_v60 = vpop.eup %2267 }
 0x3d1   : > { %v821_v61 = vsel %vm735_vm3, %v2268_v60, 0.0 }
 0x3d2   : > { %822 = vadd.xlane.f32.xlu0 %v821_v61 }
 0x438   : > { %v989_v62 = vpop.xlane.xlu1 %988 }
 0x439   : > { %v990_v63 = vsub.f32 %v983_v54, %v989_v62 }
 0x43b   : > { %v991_v2 = vmul.f32 1.442695, %v990_v63 }
 0x43c   : > { %v2239_v3 = vpop.permute.xlu1 %2238 }
 0x43d   : > { %2269 = vpow2.f32 %v991_v2  ;;  %v2241_v4 = vunpack.i.h.bf16 %v2239_v3  ;;  %v2240_v5 = vunpack.i.l.bf16 %v2239_v3 }
 0x43f   : > { %v2094_v6 = vpack.c.bf16 %v2241_v4, %v2240_v5  ;;  %v1442_v4 = vld [vmem:[#allocation8 + $0x8] sm:$0xff]  ;;  %v1443_v5 = vld [vmem:[#allocation8 + $0x10] sm:$0xff] }
 0x440   : > { %v2244_v10 = vpop.permute.xlu1 %2243 }
 0x441   : > { %2095 = vmatpush3.bf16.msra.mxu0 %v2094_v6  ;;  %v2246_v11 = vunpack.i.h.bf16 %v2244_v10  ;;  %v2245_v12 = vunpack.i.l.bf16 %v2244_v10  ;;  %v1446_v10 = vld [vmem:[#allocation8 + $0x28] sm:$0xff] }
 0x442   : > { %2100 = vmatprep.subr.bf16.mxu0 %v2517_v0 }
 0x443   : > { %v2101_v15 = vpack.c.bf16 %v2246_v11, %v2245_v12  ;;  %v1447_v12 = vld [vmem:[#allocation8 + $0x30] sm:$0xff] }
 0x444   : > { %v2249_v16 = vpop.permute.xlu1 %2248 }
 0x445   : > { %v2251_v18 = vunpack.i.h.bf16 %v2249_v16  ;;  %v2250_v19 = vunpack.i.l.bf16 %v2249_v16  ;;  %v1531_v16 = vld [vmem:[%s3097_s8 + $0x10] sm:$0xff] }
 0x447   : > { %v2270_v7 = vpop.eup %2269  ;;  %v2104_v22 = vpack.c.bf16 %v2251_v18, %v2250_v19  ;;  %v1532_v18 = vld [vmem:[%s3097_s8 + $0x18] sm:$0xff] }
 0x448   : > { %v993_v8 = vsel %vm735_vm3, %v2270_v7, 0.0  ;;  %v2133_v19 = vpack.c.bf16 %v1532_v18, %v1531_v16 }
 0x449   : > { %994 = vadd.xlane.f32.xlu1 %v993_v8 }
 0x45a   : > { %1077 = vrot.lane.b32.xlu1 %v2891_v45, %s2523_s17  ;;  %s2399_s17 = scalar_lea.vmem %s3010_s30, 512 }
 0x45b   : > { %p2400_p2 = scmp.ne.s32.totalorder %s3010_s30, %s2399_s17 }
 0x45d   : > { %p2401_p6 = pnand %p2400_p2, %p3136_p13 }
 0x45f   : > { %v823_v9 = vpop.xlane.xlu0 %822  ;;  %p2402_p10 = pneg %p2401_p6 }
 0x460   : > { %2271 = vrcp.f32 %v823_v9  ;;  %v1445_v9 = vld [vmem:[#allocation8 + $0x20] sm:$0xff] }
 0x461   : > { %v2124_v11 = vpack.c.bf16 %v1446_v10, %v1445_v9 }
 0x46a   : > { %v2272_v13 = vpop.eup %2271 }
 0x46b   : > { %v825_v14 = vmul.f32 %v2272_v13, %v2268_v60  ;;  %v1448_v13 = vld [vmem:[#allocation8 + $0x38] sm:$0xff] }
 0x46d   : > { %1421 = vst.msk [vmem:[%s2915_s19] sm:$0xff] %vm735_vm3, %v825_v14  ;;  %1973 = vmatmul.mubr.msk.f32.vlgmr.msra.gmra.mrb[4].mxu0 %vm735_vm3, %v825_v14  ;;  %v2127_v14 = vpack.c.bf16 %v1448_v13, %v1447_v12 }
 0x46e   : > { %2102 = vmatpush3.bf16.msra.mxu0 %v2101_v15  ;;  %1986 = vmatprep.mubr.msk.f32.mxu0 %vm2518_vm0, %v2519_v1  ;;  %v1530_v15 = vld [vmem:[%s3097_s8 + $0x8] sm:$0xff] }
 0x46f   : > { %2103 = vmatprep.subr.bf16.mxu0 %v2517_v0 }
 0x4d6   : > { %v995_v17 = vpop.xlane.xlu1 %994 }
 0x4d7   : > { %2273 = vrcp.f32 %v995_v17 }
 0x4da   : > { %v1078_v23 = vpop.permute.xlu1 %1077 }
 0x4e1   : > { %v2274_v20 = vpop.eup %2273 }
 0x4e2   : > { %v997_v21 = vmul.f32 %v2274_v20, %v2270_v7  ;;  %v1444_v7 = vld [vmem:[#allocation8 + $0x18] sm:$0xff]  ;;  %v1533_v20 = vld [vmem:[%s3097_s8 + $0x20] sm:$0xff] }
 0x4e3   : > { %v2121_v8 = vpack.c.bf16 %v1444_v7, %v1443_v5 }
 0x4e4   : > { %1422 = vst.msk [vmem:[%s2915_s19 + $0x8] sm:$0xff] %vm735_vm3, %v997_v21  ;;  %1987 = vmatmul.mubr.msk.f32.vlgmr.msra.gmra.mrb[6].mxu0 %vm735_vm3, %v997_v21  ;;  %v1534_v21 = vld [vmem:[%s3097_s8 + $0x28] sm:$0xff] }
 0x4e5   : > { %2106 = vmatpush3.bf16.xpose.msk.msra.mxu0 %vm2881_vm4, %v2104_v22  ;;  %1993 = vmatprep.mubr.msk.f32.mxu0 %vm2518_vm0, %v2519_v1  ;;  %v2136_v22 = vpack.c.bf16 %v1534_v21, %v1533_v20 }
 0x4e6   : > { %2114 = vmatprep.subr.bf16.mxu0 %v2517_v0 }
 0x4ec   : > { %1994 = vmatmul.mubr.msk.f32.vlgmr.msra.gmra.mrb[8].mxu0 %vm735_vm3, %v1078_v23 }
 0x4ed   : > { %2014 = vmatprep.mubr.msk.f32.mxu0 %vm2518_vm0, %v2519_v1 }
 0x540   : > { %v2934_v24 = vpop.f32.mrb[4].mxu0 }
 0x541   : > { %v1974_v25 = vpop.f32.mrb[5].mxu0 }
 0x5b7   : > { %v1073_v26 = vpop.f32.mrb[6].mxu0 }
 0x5b8   : > { %v1988_v27 = vpop.f32.mrb[7].mxu0 }
 0x5bf   : > { %v1155_v28 = vpop.f32.mrb[8].mxu0 }
 0x5c0   : > { %v1995_v29 = vpop.f32.mrb[9].mxu0  ;;  %v1159_v30 = vsel %vm735_vm3, %v1155_v28, -inf }
 0x5c1   : > { %1160 = vmax.xlane.f32.xlu0 %v1159_v30 }
 0x5d7   : > { %2253 = vrot.lane.b32.xlu0 %v2885_v43, %s2524_s14 }
 0x5db   : > { %2258 = vrot.lane.b32.xlu0 %v2885_v43, %s2525_s22 }
 0x5df   : > { %1249 = vrot.lane.b32.xlu0 %v2891_v45, %s2525_s22 }
 0x64e   : > { %v1161_v31 = vpop.xlane.xlu0 %1160 }
 0x64f   : > { %v1162_v32 = vsub.f32 %v1155_v28, %v1161_v31 }
 0x651   : > { %v1163_v33 = vmul.f32 1.442695, %v1162_v32  ;;  %v1535_v32 = vld [vmem:[%s3097_s8 + $0x30] sm:$0xff] }
 0x652   : > { %v2254_v34 = vpop.permute.xlu0 %2253 }
 0x653   : > { %2275 = vpow2.f32 %v1163_v33  ;;  %v2256_v35 = vunpack.i.h.bf16 %v2254_v34  ;;  %v2255_v36 = vunpack.i.l.bf16 %v2254_v34 }
 0x655   : > { %v2108_v37 = vpack.c.bf16 %v2256_v35, %v2255_v36 }
 0x656   : > { %v2259_v41 = vpop.permute.xlu0 %2258 }
 0x657   : > { %2109 = vmatpush3.bf16.msra.mxu1 %v2108_v37  ;;  %v2261_v44 = vunpack.i.h.bf16 %v2259_v41  ;;  %v2260_v45 = vunpack.i.l.bf16 %v2259_v41 }
 0x658   : > { %2110 = vmatprep.subr.bf16.mxu1 %v2517_v0 }
 0x659   : > { %v2111_v48 = vpack.c.bf16 %v2261_v44, %v2260_v45 }
 0x65a   : > { %v1250_v49 = vpop.permute.xlu0 %1249 }
 0x65d   : > { %v2276_v38 = vpop.eup %2275 }
 0x65e   : > { %v1165_v39 = vsel %vm735_vm3, %v2276_v38, 0.0 }
 0x65f   : > { %1166 = vadd.xlane.f32.xlu1 %v1165_v39 }
 0x6ec   : > { %v1167_v40 = vpop.xlane.xlu1 %1166 }
 0x6ed   : > { %2277 = vrcp.f32 %v1167_v40 }
 0x6f7   : > { %v2278_v46 = vpop.eup %2277 }
 0x6f8   : > { %v1169_v47 = vmul.f32 %v2278_v46, %v2276_v38 }
 0x6fa   : > { %1423 = vst.msk [vmem:[%s2915_s19 + $0x10] sm:$0xff] %vm735_vm3, %v1169_v47  ;;  %2001 = vmatmul.mubr.msk.f32.vlgmr.msra.gmra.mrb[6].mxu1 %vm735_vm3, %v1169_v47 }
 0x6fb   : > { %2113 = vmatpush3.bf16.xpose.msk.msra.mxu1 %vm2881_vm4, %v2111_v48  ;;  %2007 = vmatprep.mubr.msk.f32.mxu1 %vm2518_vm0, %v2519_v1 }
 0x6fc   : > { %2129 = vmatprep.subr.bf16.mxu1 %v2517_v0 }
 0x702   : > { %2008 = vmatmul.mubr.msk.f32.vlgmr.msra.gmra.mrb[8].mxu1 %vm735_vm3, %v1250_v49 }
 0x703   : > { %2052 = vmatprep.mubr.msk.f32.mxu1 %vm2518_vm0, %v2519_v1 }
 0x7cd   : > { %v1245_v50 = vpop.f32.mrb[6].mxu1 }
 0x7ce   : > { %v2002_v51 = vpop.f32.mrb[7].mxu1 }
 0x7d5   : > { %v1327_v52 = vpop.f32.mrb[8].mxu1 }
 0x7d6   : > { %v2009_v53 = vpop.f32.mrb[9].mxu1  ;;  %v1331_v54 = vsel %vm735_vm3, %v1327_v52, -inf }
 0x7d7   : > { %1332 = vmax.xlane.f32.xlu0 %v1331_v54 }
 0x864   : > { %v1333_v42 = vpop.xlane.xlu0 %1332 }
 0x865   : > { %v1334_v55 = vsub.f32 %v1327_v52, %v1333_v42 }
 0x867   : > { %v1335_v56 = vmul.f32 1.442695, %v1334_v55 }
 0x869   : > { %2279 = vpow2.f32 %v1335_v56 }
 0x873   : > { %v2280_v57 = vpop.eup %2279 }
 0x874   : > { %v1337_v58 = vsel %vm735_vm3, %v2280_v57, 0.0 }
 0x875   : > { %1338 = vadd.xlane.f32.xlu1 %v1337_v58 }
 0x886   : > { %2263 = vrot.lane.b32.xlu1 %v2885_v43, %s2526_s16  ;;  %v1441_v43 = vld [vmem:[#allocation8] sm:$0xff] }
 0x887   : > { %v2118_v6 = vpack.c.bf16 %v1442_v4, %v1441_v43 }
 0x88a   : > { %1426 = vrot.lane.b32.xlu1 %v1073_v26, %s2526_s16 }
 0x88e   : > { %1430 = vrot.lane.b32.xlu1 %v1245_v50, %s2524_s14  ;;  %s2403_s14 = sshll.u32 %s2527_s23, 4  ;;  %s2404_s14 = int_to_ptr.vmem [resolvable:$false] %s2403_s14 }
 0x88f   : > { %p2406_p4 = scmp.lt.s32.totalorder %s3010_s30, %s2404_s14 }
 0x902   : > { %v1339_v59 = vpop.xlane.xlu1 %1338 }
 0x903   : > { %2281 = vrcp.f32 %v1339_v59 }
 0x906   : > { %v2264_v60 = vpop.permute.xlu1 %2263 }
 0x907   : > { %v2266_v61 = vunpack.i.h.bf16 %v2264_v60  ;;  %v2265_v62 = vunpack.i.l.bf16 %v2264_v60 }
 0x909   : > { %v2115_v63 = vpack.c.bf16 %v2266_v61, %v2265_v62 }
 0x90a   : > { %v1427_v26 = vpop.permute.xlu1 %1426 }
 0x90b   : > { %2116 = vmatpush3.bf16.msra.mxu0 %v2115_v63  ;;  %v1437_v28 = vsel %vm735_vm3, %v2934_v24, %v1427_v26  ;;  %v1834_v24 = vld [vmem:[%s3096_s7] ss:$0 sm:$0xff] }
 0x90c   : > { %2117 = vmatprep.subr.bf16.mxu0 %v2517_v0 }
 0x90d   : > { %v2282_v2 = vpop.eup %2281 }
 0x90e   : > { %v1341_v3 = vmul.f32 %v2282_v2, %v2280_v57  ;;  %v1431_v27 = vpop.permute.xlu1 %1430 }
 0x90f   : > { %v1438_v29 = vsel %vm491_vm1, %v1437_v28, %v1431_v27 }
 0x910   : > { %1424 = vst.msk [vmem:[%s2915_s19 + $0x18] sm:$0xff] %vm735_vm3, %v1341_v3  ;;  %2015 = vmatmul.mubr.msk.f32.vlgmr.msra.gmra.mrb[10].mxu0 %vm735_vm3, %v1341_v3  ;;  %s2405_s19 = scalar_lea.vmem %s2404_s14, 1024 }
 0x911   : > { %2033 = vmatprep.mubr.msk.f32.mxu0 %vm2518_vm0, %v2519_v1  ;;  %2119 = vmatpush3.bf16.msra.mxu0 %v2118_v6  ;;  %v1529_v1 = vld [vmem:[%s3097_s8] sm:$0xff]  ;;  %p2407_p5 = scmp.lt.s32.totalorder %s2405_s19, %s2399_s17 }
 0x912   : > { %2120 = vmatprep.subr.bf16.mxu0 %v2517_v0  ;;  %v2130_v17 = vpack.c.bf16 %v1530_v15, %v1529_v1 }
 0x913   : > { %p2408_p3 = por %p2407_p5, %p2406_p4 }
 0x914   : > { %2131 = vmatpush3.bf16.msra.mxu1 %v2130_v17 }
 0x915   : > { %2122 = vmatpush3.bf16.msra.mxu0 %v2121_v8  ;;  %2132 = vmatprep.subr.bf16.mxu1 %v2517_v0  ;;  %p2409_p7 = pnand %p2408_p3, %p2402_p10 }
 0x916   : > { %2123 = vmatprep.subr.bf16.mxu0 %v2517_v0 }
 0x918   : > { %2134 = vmatpush3.bf16.msra.mxu1 %v2133_v19 }
 0x919   : > { %2125 = vmatpush3.bf16.msra.mxu0 %v2124_v11  ;;  %2135 = vmatprep.subr.bf16.mxu1 %v2517_v0 }
 0x91a   : > { %2126 = vmatprep.subr.bf16.mxu0 %v2517_v0 }
 0x91c   : > { %2137 = vmatpush3.bf16.msra.mxu1 %v2136_v22 }
 0x91d   : > { %2128 = vmatpush3.bf16.msra.mxu0 %v2127_v14  ;;  %2138 = vmatprep.subr.bf16.mxu1 %v2517_v0  ;;  %v1536_v0 = vld [vmem:[%s3097_s8 + $0x38] sm:$0xff] }
 0x91e   : > { %v2139_v33 = vpack.c.bf16 %v1536_v0, %v1535_v32 }
 0x920   : > { %2140 = vmatpush3.bf16.msra.mxu1 %v2139_v33 }
 0x9e3   : > { %v1417_v23 = vpop.f32.mrb[10].mxu0 }
 0x9e4   : > { %1434 = vrot.lane.b32.xlu0 %v1417_v23, %s2522_s25  ;;  %v2016_v25 = vpop.f32.mrb[11].mxu0 }
 0xa56   : > { %v1435_v30 = vpop.permute.xlu0 %1434 }
 0xa57   : > { %v1440_v31 = vsel %vm1439_vm5, %v1438_v29, %v1435_v30 }
 0xa58   : > { %2034 = vmatmul.mubr.msk.f32.vlgmr.msra.gmra.mrb[12].mxu0 %vm574_vm2, %v1440_v31 }
 0xb2b   : > { %v1525_v34 = vpop.f32.mrb[12].mxu0 }
 0xb2c   : > { %v1526_v35 = vadd.f32 %v1834_v24, %v1525_v34  ;;  %v2035_v36 = vpop.f32.mrb[13].mxu0 }
 0xb2e   : > { %2053 = vmatmul.mubr.msk.f32.vlgmr.msra.gmra.mrb[10].mxu1 %vm574_vm2, %v1526_v35 }
 0xb2f   : > { %2412 = shalt.err (!%p2409_p7)
}
 0xb30   : > { %s2413_s22 = scalar_lea.hbm %s3008_s13, 512  ;;  %s2417_s12 = scalar_lea.hbm %s3100_s11, 1024 }
 0xb31   : > { %p2414_p1 = scmp.ne.s32.totalorder %s3008_s13, %s2413_s22  ;;  %p2418_p0 = scmp.lt.u32.totalorder %s3008_s13, %s3100_s11 }
 0xb32   : > { %p2419_p9 = scmp.lt.u32.totalorder %s2417_s12, %s2413_s22  ;;  %p2421_p2 = scmp.lt.u32.totalorder %s2413_s22, %s3008_s13 }
 0xb33   : > { %p2415_p8 = pnand %p2414_p1, %p3136_p13 }
 0xb34   : > { %p2420_p12 = por %p2419_p9, %p2418_p0 }
 0xb35   : > { %p2416_p11 = pneg %p2415_p8 }
 0xb36   : > { %p2422_p6 = por %p2421_p2, %p2420_p12 }
 0xb38   : > { %p2423_p10 = pnand %p2422_p6, %p2416_p11 }
 0xb3a   : > { %2426 = shalt.err (!%p2423_p10)
}
 0xb3b   : > { %s2528_s5 = smov 128   ;;  %s2529_s29 = smov 8   ;;  %v1836_v37 = vld [vmem:[%s3098_s9] ss:$0 sm:$0xff] }
 0xb3c   : > { %2154 = dma.vmem_to_hbm [thread:$0]  (%p3136_p13), %s3010_s30, 512, %s3008_s13, %s1624_s27, %s2528_s5, %s2528_s5, %s2529_s29  }
 0xb3d   : > { %s1840_s23 = sshll.u32 %s2612_s21, 7  ;;  %s471_s14 = scalar_lea.vmem [#allocation10], %s2794_s6 }
 0xb3e   : > { %s1637_s19 = sshll.u32 %s471_s14, 4  ;;  %s3137_s16 = sld [smem:[#allocation26_spill]]  ;;  %s3046_s19 = int_to_ptr.vmem [resolvable:$true] %s1637_s19 }
 0xb3f   : > { %s1619_s30 = scalar_lea.sflag [#allocation4], %s2791_s26  ;;  %s2427_s13 = scalar_lea.vmem %s3046_s19, 128 }
 0xb40   : > { %p2428_p4 = scmp.ne.s32.totalorder %s3046_s19, %s2427_s13  ;;  %s2530_s21 = smov [#allocation10]  }
 0xb41   : > { %s2431_s6 = sshll.u32 %s2530_s21, 4  ;;  %s2432_s6 = int_to_ptr.vmem [resolvable:$false] %s2431_s6 }
 0xb42   : > { %p2429_p5 = pnand %p2428_p4, %p3136_p13  ;;  %s2433_s27 = scalar_lea.vmem %s2432_s6, 256 }
 0xb43   : > { %p2434_p7 = scmp.lt.s32.totalorder %s3046_s19, %s2432_s6  ;;  %p2435_p1 = scmp.lt.s32.totalorder %s2433_s27, %s2427_s13 }
 0xb44   : > { %s3044_s12 = scalar_lea.hbm %s3137_s16, %s1840_s23  ;;  %p2430_p3 = pneg %p2429_p5 }
 0xb45   : > { %p2436_p8 = por %p2435_p1, %p2434_p7 }
 0xb47   : > { %p2437_p11 = pnand %p2436_p8, %p2430_p3 }
 0xc01   : > { %v1613_v38 = vpop.f32.mrb[10].mxu1 }
 0xc02   : > { %v1614_v39 = vadd.f32 %v1836_v37, %v1613_v38  ;;  %v2054_v40 = vpop.f32.mrb[11].mxu1 }
 0xc04   : > { %1617 = vst.msk [vmem:[%s471_s14] sm:$0xff] %vm491_vm1, %v1614_v39 }
 0xc05   : > { %2440 = shalt.err (!%p2437_p11)
}
 0xc06   : > { %s2441_s26 = scalar_lea.hbm %s3044_s12, 128  ;;  %s2445_s5 = scalar_lea.hbm %s3137_s16, 256 }
 0xc07   : > { %p2442_p0 = scmp.ne.s32.totalorder %s3044_s12, %s2441_s26  ;;  %p2446_p2 = scmp.lt.u32.totalorder %s3044_s12, %s3137_s16 }
 0xc08   : > { %p2447_p6 = scmp.lt.u32.totalorder %s2445_s5, %s2441_s26  ;;  %p2449_p4 = scmp.lt.u32.totalorder %s2441_s26, %s3044_s12 }
 0xc09   : > { %p2443_p9 = pnand %p2442_p0, %p3136_p13 }
 0xc0a   : > { %p2448_p10 = por %p2447_p6, %p2446_p2 }
 0xc0b   : > { %p2444_p12 = pneg %p2443_p9 }
 0xc0c   : > { %p2450_p5 = por %p2449_p4, %p2448_p10 }
 0xc0e   : > { %p2451_p3 = pnand %p2450_p5, %p2444_p12 }
 0xc10   : > { %2454 = shalt.err (!%p2451_p3)
}
 0xc11   : > { %2153 = dma.vmem_to_hbm [thread:$0]  (%p3136_p13), %s3046_s19, 128, %s3044_s12, %s1619_s30  }
 0xc12 PF: > { %s3138_s17 = sld [smem:[#allocation19_spill]]  ;;  %s3139_s23 = sld [smem:[#allocation21_spill]] }
 0xc13   : > { %p3141_p1 = scmp.ge.s32.totalorder %s2509_s20, 2 }
 0xc18   : > { %s1665_s14 = sand.u32 1, %s3138_s17   ;;  %p3140_p7 = scmp.ne.s32.totalorder %s3139_s23, 0 }
 0xc19   : > { %s1666_s22 = scalar_lea.sflag [#allocation4], %s1665_s14 }
 0xc1a   : > { %p2172_p8 = pnand %p3141_p1, %p3140_p7 }
 0xc1c   : > { %2488 = dma.done.wait (!%p2172_p8), %s1666_s22, 128  }
 0xc1d   : > { %2490 = vsyncadd (!%p2172_p8), %s1666_s22, 4294967168  ;;  %s1675_s25 = scalar_lea.sflag [#allocation12], %s1665_s14 }
 0xc1e   : > { %2492 = dma.done.wait (!%p2172_p8), %s1675_s25, 512  }
 0xc1f   : > { %2494 = vsyncadd (!%p2172_p8), %s1675_s25, 4294966784  ;;  %s3142_s20 = sld [smem:[#allocation22_spill]]  ;;  %s3143_s15 = sld [smem:[#allocation20_spill]] }
 0xc20   : > { %s3144_s19 = sld [smem:[#allocation23_spill]]  ;;  %s3145_s17 = smov %s2501_s18 }
 0xc25   : > { %p32_p13 = scmp.ge.s32.totalorder %s3142_s20, 4   ;;  %s3146_s18 = smov %s3143_s15 }
 0xc27   :  { %34 = sbr.rel (!%p32_p13) target bundleno = 14 (0xe), region = 143 }
 0xc2e   :  { %1680 = vsyncpa [#allocation3], 1 }
 0xc2f   :  { %1682 = vsyncpa [#allocation3 + $0x1], 1 }
 0xc30   :  { %1683 = vsyncpa [#allocation6], 1 }
 0xc31   :  { %1685 = vsyncpa [#allocation6 + $0x1], 1 }
 0xc32   :  { %1686 = vsyncpa [#allocation9], 1 }
 0xc33   :  { %1687 = vsyncpa [#allocation4], 1 }
 0xc34   :  { %1689 = vsyncpa [#allocation4 + $0x1], 1 }
 0xc35   :  { %1690 = vsyncpa [#allocation12], 1 }
 0xc36   :  { %1692 = vsyncpa [#allocation12 + $0x1], 1 }

</bundles_post_ra>
